<compile_context>
chip_gen: v7x
topology: tpu7x:2x2x1
jax: 0.10.0
libtpu: 0.0.40
codegen_flags: <defaults>
</compile_context>

<pallas_src>
import jax
import jax.numpy as jnp
from jax.experimental import pallas as pl
from jax.experimental.pallas import tpu as pltpu


def _round_up(x, m):
    return (x + m - 1) // m * m


def _sublane_granule(dtype):
    itemsize = jnp.dtype(dtype).itemsize
    if itemsize >= 4:
        return 8
    if itemsize == 2:
        return 16
    return 32


def _vmem_capacity_bytes():
    """Per-core VMEM capacity; falls back to v7x's 64 MiB (safe everywhere)."""
    try:
        info = pltpu.get_tpu_info()
        cap = getattr(info, "vmem_capacity_bytes", None)
        if cap:
            return int(cap)
    except Exception:
        pass
    return 64 * 1024 * 1024


def _make_gcn_kernel(w_first: bool, vpu_agg: bool):
    def kernel(seq_ref, adj_ref, w_ref, b_ref, alpha_ref, out_ref):
        bb, n, fi = seq_ref.shape
        fo = w_ref.shape[1]

        seq = seq_ref[...]            # (BB, N, F_in)   operand dtype
        adj = adj_ref[...]            # (BB, N, N)      operand dtype
        w = w_ref[...]                # (F_in, F_out)   operand dtype

        if w_first:
            # Hoisted linear: ONE (BB*N, F_in) x (F_in, F_out) MXU matmul.
            feats = jnp.dot(seq.reshape(bb * n, fi), w,
                            preferred_element_type=jnp.float32)
            feats = feats.reshape(bb, n, fo)
            if vpu_agg:
                # Small-N aggregation on the VPU: avoids B tiny K=N systolic
                # passes (<=12% MXU fill) and keeps intermediates in f32.
                adj_f = adj.astype(jnp.float32)
                acc = adj_f[:, :, 0:1] * feats[:, 0:1, :]
                for m in range(1, n):
                    acc = acc + adj_f[:, :, m:m + 1] * feats[:, m:m + 1, :]
                out = acc
            else:
                # Large-N path: batched MXU aggregation.  NOTE: on the bf16
                # operand path feats is downcast between the two matmuls
                # (documented extra rounding beyond the bf16 MXU inputs).
                out = jnp.einsum('bnm,bmo->bno', adj, feats.astype(seq.dtype),
                                 preferred_element_type=jnp.float32)
        else:
            # Aggregate first (cheaper when F_in < F_out): adj @ seq, then @ W.
            if vpu_agg:
                adj_f = adj.astype(jnp.float32)
                seq_f = seq.astype(jnp.float32)
                agg = adj_f[:, :, 0:1] * seq_f[:, 0:1, :]
                for m in range(1, n):
                    agg = agg + adj_f[:, :, m:m + 1] * seq_f[:, m:m + 1, :]
            else:
                agg = jnp.einsum('bnm,bmf->bnf', adj, seq,
                                 preferred_element_type=jnp.float32)
            agg = agg.astype(seq.dtype).reshape(bb * n, fi)
            out = jnp.dot(agg, w,
                          preferred_element_type=jnp.float32).reshape(bb, n, fo)

        # Epilogue in f32: bias add + PReLU (single shared alpha from SMEM).
        out = out + b_ref[...].reshape(1, 1, fo)
        alpha = alpha_ref[0]
        out = jnp.where(out > 0.0, out, alpha * out)
        out_ref[...] = out.astype(out_ref.dtype)

    return kernel


def gcn_forward(seq, adj, weight_t, bias, alpha, *,
                compute_dtype=None, batch_block=None, order="auto",
                vpu_agg_max_n=64):
    """Dense GCN forward (PyTorch GCN.forward with sparse=False).

    seq:      (B, N, F_in)
    adj:      (B, N, N)
    weight_t: (F_in, F_out)  (nn.Linear weight, pre-transposed)
    bias:     (F_out,)
    alpha:    scalar PReLU parameter
    compute_dtype: optional operand dtype for the MXU (jnp.bfloat16 is
        profitable on v5e, v6e and v7x: bf16-native MXU, half the HBM bytes);
        accumulation is always f32 and the output keeps seq's original dtype.
    """
    B, N, F_in = seq.shape
    F_out = weight_t.shape[1]
    out_dtype = seq.dtype

    if compute_dtype is not None:
        seq = seq.astype(compute_dtype)
        adj = adj.astype(compute_dtype)
        weight_t = weight_t.astype(compute_dtype)

    in_dtype = seq.dtype
    in_itemsize = jnp.dtype(in_dtype).itemsize
    out_itemsize = jnp.dtype(out_dtype).itemsize

    # Lane/sublane-dense padding targets: features to 128 lanes, nodes to the
    # dtype's sublane granule (8 f32 / 16 bf16 / 32 int8).
    sub = _sublane_granule(in_dtype)
    N_pad = _round_up(N, sub)
    Fi_pad = _round_up(F_in, 128)
    Fo_pad = _round_up(F_out, 128)

    use_vpu_agg = N_pad <= vpu_agg_max_n

    # Matmul order: aggregate over the smaller feature dim (fewer MXU FLOPs /
    # fewer VPU broadcast-MACs).  Only differs when padded F_in != F_out.
    if order == "auto":
        w_first = Fo_pad <= Fi_pad
    else:
        w_first = (order == "w_first")

    # ---- VMEM-aware batch-block sizing ------------------------------------
    vmem_total = _vmem_capacity_bytes()
    if vmem_total >= 96 * 1024 * 1024:          # v5e / v6e: 128 MiB per core
        vmem_limit = 64 * 1024 * 1024
    else:                                       # v7x: 64 MiB per TensorCore
        vmem_limit = 36 * 1024 * 1024

    # Per-batch-element resident bytes for one grid step, counting the 2x
    # double-buffering of streamed blocks and the f32 intermediates the kernel
    # materializes (feats/agg, pre-epilogue out, f32 adjacency on VPU path).
    per_batch = (
        2 * N_pad * Fi_pad * in_itemsize                 # seq block (x2 bufs)
        + 2 * N_pad * N_pad * in_itemsize                # adj block (x2 bufs)
        + 2 * N_pad * Fo_pad * out_itemsize              # out block (x2 bufs)
        + 4 * N_pad * (Fo_pad if w_first else Fi_pad)    # feats / agg (f32)
        + 4 * N_pad * Fo_pad                             # pre-epilogue f32 out
        + (4 * N_pad * N_pad if use_vpu_agg else 0)      # adj cast to f32
    )
    fixed = 2 * Fi_pad * Fo_pad * in_itemsize + 2 * Fo_pad * 4   # W + bias
    headroom = 4 * 1024 * 1024                   # compiler scratch slack
    budget = max(vmem_limit - fixed - headroom, per_batch)

    BB_cap = int(max(1, min(B, budget // per_batch)))
    # Keep at least two grid steps when B > 1 so the "parallel" batch axis can
    # be sharded across the two v7x TensorCores (costs ~0.35us elsewhere).
    if B > 1:
        BB_cap = min(BB_cap, pl.cdiv(B, 2))
    # Prefer a BB that divides B (no padded-batch garbage work) unless that
    # would more than double the number of grid steps.
    BB = 1
    for d in range(1, BB_cap + 1):
        if B % d == 0:
            BB = d
    if BB < max(1, BB_cap // 2):
        BB = BB_cap
    if batch_block is not None:
        BB = int(max(1, min(batch_block, B)))

    B_pad = _round_up(B, BB)
    grid = (B_pad // BB,)
    # TODO(synk): on v6e/v7x prefer BB*N_pad and Fo_pad that are multiples of
    # 256 (2x256 MXU) when the shape allows; 128-granular tiles halve MXU fill.

    # ---- Padding: only when actually needed (padded rows/cols are inert) ---
    def _pad_to(x, shape):
        if tuple(x.shape) == tuple(shape):
            return x
        return jnp.pad(x, [(0, t - s) for s, t in zip(x.shape, shape)])

    seq_p = _pad_to(seq, (B_pad, N_pad, Fi_pad))
    adj_p = _pad_to(adj, (B_pad, N_pad, N_pad))
    w_p = _pad_to(weight_t, (Fi_pad, Fo_pad))
    b_p = _pad_to(bias.astype(jnp.float32).reshape(1, F_out), (1, Fo_pad))
    alpha_p = jnp.asarray(alpha, jnp.float32).reshape(1)
    # TODO(synk): for large unaligned N/F, handle the ragged edge inside the
    # kernel (full-array blocks are legal without (8,128) divisibility) instead
    # of materializing padded HBM copies of seq and adj.
    # TODO(synk): for very large N, add a node-row grid axis tiling adj as
    # (BB, tile_n, N_pad) and out as (BB, tile_n, Fo_pad), holding feats in a
    # per-batch-block VMEM scratch (keeps v7x's 64 MiB VMEM viable).

    out = pl.pallas_call(
        _make_gcn_kernel(w_first, use_vpu_agg),
        out_shape=jax.ShapeDtypeStruct((B_pad, N_pad, Fo_pad), out_dtype),
        grid_spec=pltpu.PrefetchScalarGridSpec(
            num_scalar_prefetch=0,
            grid=grid,
            in_specs=[
                pl.BlockSpec((BB, N_pad, Fi_pad), lambda b: (b, 0, 0)),
                pl.BlockSpec((BB, N_pad, N_pad), lambda b: (b, 0, 0)),
                pl.BlockSpec((Fi_pad, Fo_pad), lambda b: (0, 0)),
                pl.BlockSpec((1, Fo_pad), lambda b: (0, 0)),
                pl.BlockSpec(memory_space=pltpu.MemorySpace.SMEM),
            ],
            out_specs=pl.BlockSpec((BB, N_pad, Fo_pad), lambda b: (b, 0, 0)),
        ),
        compiler_params=pltpu.CompilerParams(
            dimension_semantics=("parallel",),
            vmem_limit_bytes=vmem_limit,
        ),
    )(seq_p, adj_p, w_p, b_p, alpha_p)

    return out[:B, :N, :F_out]


if __name__ == "__main__":
    # Small shapes consistent with the module's dense forward path.
    B, N, F_IN, F_OUT = 2, 16, 32, 32

    key = jax.random.PRNGKey(0)
    k_seq, k_adj, k_w = jax.random.split(key, 3)

    seq = jax.random.normal(k_seq, (B, N, F_IN), dtype=jnp.float32)
    # Row-normalized random dense adjacency.
    adj_raw = jax.random.uniform(k_adj, (B, N, N), dtype=jnp.float32)
    adj = adj_raw / jnp.sum(adj_raw, axis=-1, keepdims=True)

    # Parameters mirroring the PyTorch module's __init__:
    #   nn.Linear weight: xavier_uniform_, shape (out_ft, in_ft) -> stored transposed.
    bound = (6.0 / (F_IN + F_OUT)) ** 0.5
    w = jax.random.uniform(k_w, (F_OUT, F_IN), dtype=jnp.float32,
                           minval=-bound, maxval=bound)
    weight_t = w.T                                   # (F_in, F_out)
    bias = jnp.zeros((F_OUT,), dtype=jnp.float32)    # bias.data.fill_(0.0)
    alpha = jnp.float32(0.25)                        # nn.PReLU() default

    # Plain-JAX reference (same math as the PyTorch module).
    feats_ref = jnp.einsum('bnf,fo->bno', seq, weight_t)
    out_ref = jnp.einsum('bnm,bmo->bno', adj, feats_ref) + bias
    out_ref = jnp.where(out_ref > 0, out_ref, alpha * out_ref)

    # 1) f32, small-N VPU-aggregation path (default).
    out_f32 = jax.block_until_ready(gcn_forward(seq, adj, weight_t, bias, alpha))
    assert out_f32.shape == (B, N, F_OUT) and out_f32.dtype == jnp.float32
    assert jnp.allclose(out_f32, out_ref, atol=1e-5, rtol=1e-5)

    # 2) f32, forced MXU batched-einsum aggregation (large-N code path).
    out_mxu = jax.block_until_ready(
        gcn_forward(seq, adj, weight_t, bias, alpha, vpu_agg_max_n=0))
    assert jnp.allclose(out_mxu, out_ref, atol=1e-5, rtol=1e-5)

    # 3) f32, aggregate-first matmul order.
    out_alt = jax.block_until_ready(
        gcn_forward(seq, adj, weight_t, bias, alpha, order="adj_first"))
    assert jnp.allclose(out_alt, out_ref, atol=1e-5, rtol=1e-5)

    # 4) bf16-operand / f32-accumulate MXU fast path (v5e/v6e/v7x).
    out_bf16 = jax.block_until_ready(
        gcn_forward(seq, adj, weight_t, bias, alpha, compute_dtype=jnp.bfloat16))
    assert jnp.allclose(out_bf16, out_ref, atol=5e-2, rtol=5e-2)

    print("KERNEL_OK")
</pallas_src>

<mosaic_0001>
module attributes {stable_mosaic.version = 11 : i64} {
  func.func @kernel(%arg0: i32, %arg1: memref<1x16x128xf32, #tpu.memory_space<vmem>>, %arg2: memref<1x16x16xf32, #tpu.memory_space<vmem>>, %arg3: memref<128x128xf32, #tpu.memory_space<vmem>>, %arg4: memref<1x128xf32, #tpu.memory_space<vmem>>, %arg5: memref<1xf32, #tpu.memory_space<smem>>, %arg6: memref<1x16x128xf32, #tpu.memory_space<vmem>>) attributes {dimension_semantics = [#tpu.dimension_semantics<parallel>], iteration_bounds = array<i64: 2>, scalar_prefetch = 0 : i64, scratch_operands = 0 : i64, tpu.core_type = #tpu.core_type<tc>, window_params = [{transform_indices = @transform_0, window_bounds = array<i64: 1, 16, 128>}, {transform_indices = @transform_1, window_bounds = array<i64: 1, 16, 16>}, {pipeline_mode = #tpu.pipeline_mode<synchronous>, transform_indices = @transform_2, window_bounds = array<i64: 128, 128>}, {pipeline_mode = #tpu.pipeline_mode<synchronous>, transform_indices = @transform_3, window_bounds = array<i64: 1, 128>}, {transform_indices = @transform_4, window_bounds = array<i64: 1>}, {transform_indices = @transform_5, window_bounds = array<i64: 1, 16, 128>}]} {
    %c0 = arith.constant 0 : index
    %c0_0 = arith.constant 0 : index
    %c0_1 = arith.constant 0 : index
    %0 = vector.load %arg1[%c0, %c0_0, %c0_1] : memref<1x16x128xf32, #tpu.memory_space<vmem>>, vector<1x16x128xf32>
    %c0_2 = arith.constant 0 : index
    %c0_3 = arith.constant 0 : index
    %c0_4 = arith.constant 0 : index
    %1 = vector.load %arg2[%c0_2, %c0_3, %c0_4] : memref<1x16x16xf32, #tpu.memory_space<vmem>>, vector<1x16x16xf32>
    %c0_5 = arith.constant 0 : index
    %c0_6 = arith.constant 0 : index
    %2 = vector.load %arg3[%c0_5, %c0_6] : memref<128x128xf32, #tpu.memory_space<vmem>>, vector<128x128xf32>
    %3 = vector.shape_cast %0 : vector<1x16x128xf32> to vector<16x128xf32>
    %cst = arith.constant dense<0.000000e+00> : vector<16x128xf32>
    %4 = tpu.matmul %3, %2, %cst {dimension_numbers = #tpu.dot_dimension_numbers<[1], [0], [0], [1], [0, 0, 1, 1], [], []>} : vector<16x128xf32>, vector<128x128xf32>, vector<16x128xf32> -> vector<16x128xf32>
    %5 = vector.shape_cast %4 : vector<16x128xf32> to vector<1x16x128xf32>
    %6 = vector.extract_strided_slice %1 {offsets = [0, 0, 0], sizes = [1, 16, 1], strides = [1, 1, 1]} : vector<1x16x16xf32> to vector<1x16x1xf32>
    %7 = vector.extract_strided_slice %5 {offsets = [0, 0, 0], sizes = [1, 1, 128], strides = [1, 1, 1]} : vector<1x16x128xf32> to vector<1x1x128xf32>
    %8 = vector.broadcast %6 : vector<1x16x1xf32> to vector<1x16x128xf32>
    %9 = vector.broadcast %7 : vector<1x1x128xf32> to vector<1x16x128xf32>
    %10 = arith.mulf %8, %9 : vector<1x16x128xf32>
    %11 = vector.extract_strided_slice %1 {offsets = [0, 0, 1], sizes = [1, 16, 1], strides = [1, 1, 1]} : vector<1x16x16xf32> to vector<1x16x1xf32>
    %12 = vector.extract_strided_slice %5 {offsets = [0, 1, 0], sizes = [1, 1, 128], strides = [1, 1, 1]} : vector<1x16x128xf32> to vector<1x1x128xf32>
    %13 = vector.broadcast %11 : vector<1x16x1xf32> to vector<1x16x128xf32>
    %14 = vector.broadcast %12 : vector<1x1x128xf32> to vector<1x16x128xf32>
    %15 = arith.mulf %13, %14 : vector<1x16x128xf32>
    %16 = arith.addf %10, %15 : vector<1x16x128xf32>
    %17 = vector.extract_strided_slice %1 {offsets = [0, 0, 2], sizes = [1, 16, 1], strides = [1, 1, 1]} : vector<1x16x16xf32> to vector<1x16x1xf32>
    %18 = vector.extract_strided_slice %5 {offsets = [0, 2, 0], sizes = [1, 1, 128], strides = [1, 1, 1]} : vector<1x16x128xf32> to vector<1x1x128xf32>
    %19 = vector.broadcast %17 : vector<1x16x1xf32> to vector<1x16x128xf32>
    %20 = vector.broadcast %18 : vector<1x1x128xf32> to vector<1x16x128xf32>
    %21 = arith.mulf %19, %20 : vector<1x16x128xf32>
    %22 = arith.addf %16, %21 : vector<1x16x128xf32>
    %23 = vector.extract_strided_slice %1 {offsets = [0, 0, 3], sizes = [1, 16, 1], strides = [1, 1, 1]} : vector<1x16x16xf32> to vector<1x16x1xf32>
    %24 = vector.extract_strided_slice %5 {offsets = [0, 3, 0], sizes = [1, 1, 128], strides = [1, 1, 1]} : vector<1x16x128xf32> to vector<1x1x128xf32>
    %25 = vector.broadcast %23 : vector<1x16x1xf32> to vector<1x16x128xf32>
    %26 = vector.broadcast %24 : vector<1x1x128xf32> to vector<1x16x128xf32>
    %27 = arith.mulf %25, %26 : vector<1x16x128xf32>
    %28 = arith.addf %22, %27 : vector<1x16x128xf32>
    %29 = vector.extract_strided_slice %1 {offsets = [0, 0, 4], sizes = [1, 16, 1], strides = [1, 1, 1]} : vector<1x16x16xf32> to vector<1x16x1xf32>
    %30 = vector.extract_strided_slice %5 {offsets = [0, 4, 0], sizes = [1, 1, 128], strides = [1, 1, 1]} : vector<1x16x128xf32> to vector<1x1x128xf32>
    %31 = vector.broadcast %29 : vector<1x16x1xf32> to vector<1x16x128xf32>
    %32 = vector.broadcast %30 : vector<1x1x128xf32> to vector<1x16x128xf32>
    %33 = arith.mulf %31, %32 : vector<1x16x128xf32>
    %34 = arith.addf %28, %33 : vector<1x16x128xf32>
    %35 = vector.extract_strided_slice %1 {offsets = [0, 0, 5], sizes = [1, 16, 1], strides = [1, 1, 1]} : vector<1x16x16xf32> to vector<1x16x1xf32>
    %36 = vector.extract_strided_slice %5 {offsets = [0, 5, 0], sizes = [1, 1, 128], strides = [1, 1, 1]} : vector<1x16x128xf32> to vector<1x1x128xf32>
    %37 = vector.broadcast %35 : vector<1x16x1xf32> to vector<1x16x128xf32>
    %38 = vector.broadcast %36 : vector<1x1x128xf32> to vector<1x16x128xf32>
    %39 = arith.mulf %37, %38 : vector<1x16x128xf32>
    %40 = arith.addf %34, %39 : vector<1x16x128xf32>
    %41 = vector.extract_strided_slice %1 {offsets = [0, 0, 6], sizes = [1, 16, 1], strides = [1, 1, 1]} : vector<1x16x16xf32> to vector<1x16x1xf32>
    %42 = vector.extract_strided_slice %5 {offsets = [0, 6, 0], sizes = [1, 1, 128], strides = [1, 1, 1]} : vector<1x16x128xf32> to vector<1x1x128xf32>
    %43 = vector.broadcast %41 : vector<1x16x1xf32> to vector<1x16x128xf32>
    %44 = vector.broadcast %42 : vector<1x1x128xf32> to vector<1x16x128xf32>
    %45 = arith.mulf %43, %44 : vector<1x16x128xf32>
    %46 = arith.addf %40, %45 : vector<1x16x128xf32>
    %47 = vector.extract_strided_slice %1 {offsets = [0, 0, 7], sizes = [1, 16, 1], strides = [1, 1, 1]} : vector<1x16x16xf32> to vector<1x16x1xf32>
    %48 = vector.extract_strided_slice %5 {offsets = [0, 7, 0], sizes = [1, 1, 128], strides = [1, 1, 1]} : vector<1x16x128xf32> to vector<1x1x128xf32>
    %49 = vector.broadcast %47 : vector<1x16x1xf32> to vector<1x16x128xf32>
    %50 = vector.broadcast %48 : vector<1x1x128xf32> to vector<1x16x128xf32>
    %51 = arith.mulf %49, %50 : vector<1x16x128xf32>
    %52 = arith.addf %46, %51 : vector<1x16x128xf32>
    %53 = vector.extract_strided_slice %1 {offsets = [0, 0, 8], sizes = [1, 16, 1], strides = [1, 1, 1]} : vector<1x16x16xf32> to vector<1x16x1xf32>
    %54 = vector.extract_strided_slice %5 {offsets = [0, 8, 0], sizes = [1, 1, 128], strides = [1, 1, 1]} : vector<1x16x128xf32> to vector<1x1x128xf32>
    %55 = vector.broadcast %53 : vector<1x16x1xf32> to vector<1x16x128xf32>
    %56 = vector.broadcast %54 : vector<1x1x128xf32> to vector<1x16x128xf32>
    %57 = arith.mulf %55, %56 : vector<1x16x128xf32>
    %58 = arith.addf %52, %57 : vector<1x16x128xf32>
    %59 = vector.extract_strided_slice %1 {offsets = [0, 0, 9], sizes = [1, 16, 1], strides = [1, 1, 1]} : vector<1x16x16xf32> to vector<1x16x1xf32>
    %60 = vector.extract_strided_slice %5 {offsets = [0, 9, 0], sizes = [1, 1, 128], strides = [1, 1, 1]} : vector<1x16x128xf32> to vector<1x1x128xf32>
    %61 = vector.broadcast %59 : vector<1x16x1xf32> to vector<1x16x128xf32>
    %62 = vector.broadcast %60 : vector<1x1x128xf32> to vector<1x16x128xf32>
    %63 = arith.mulf %61, %62 : vector<1x16x128xf32>
    %64 = arith.addf %58, %63 : vector<1x16x128xf32>
    %65 = vector.extract_strided_slice %1 {offsets = [0, 0, 10], sizes = [1, 16, 1], strides = [1, 1, 1]} : vector<1x16x16xf32> to vector<1x16x1xf32>
    %66 = vector.extract_strided_slice %5 {offsets = [0, 10, 0], sizes = [1, 1, 128], strides = [1, 1, 1]} : vector<1x16x128xf32> to vector<1x1x128xf32>
    %67 = vector.broadcast %65 : vector<1x16x1xf32> to vector<1x16x128xf32>
    %68 = vector.broadcast %66 : vector<1x1x128xf32> to vector<1x16x128xf32>
    %69 = arith.mulf %67, %68 : vector<1x16x128xf32>
    %70 = arith.addf %64, %69 : vector<1x16x128xf32>
    %71 = vector.extract_strided_slice %1 {offsets = [0, 0, 11], sizes = [1, 16, 1], strides = [1, 1, 1]} : vector<1x16x16xf32> to vector<1x16x1xf32>
    %72 = vector.extract_strided_slice %5 {offsets = [0, 11, 0], sizes = [1, 1, 128], strides = [1, 1, 1]} : vector<1x16x128xf32> to vector<1x1x128xf32>
    %73 = vector.broadcast %71 : vector<1x16x1xf32> to vector<1x16x128xf32>
    %74 = vector.broadcast %72 : vector<1x1x128xf32> to vector<1x16x128xf32>
    %75 = arith.mulf %73, %74 : vector<1x16x128xf32>
    %76 = arith.addf %70, %75 : vector<1x16x128xf32>
    %77 = vector.extract_strided_slice %1 {offsets = [0, 0, 12], sizes = [1, 16, 1], strides = [1, 1, 1]} : vector<1x16x16xf32> to vector<1x16x1xf32>
    %78 = vector.extract_strided_slice %5 {offsets = [0, 12, 0], sizes = [1, 1, 128], strides = [1, 1, 1]} : vector<1x16x128xf32> to vector<1x1x128xf32>
    %79 = vector.broadcast %77 : vector<1x16x1xf32> to vector<1x16x128xf32>
    %80 = vector.broadcast %78 : vector<1x1x128xf32> to vector<1x16x128xf32>
    %81 = arith.mulf %79, %80 : vector<1x16x128xf32>
    %82 = arith.addf %76, %81 : vector<1x16x128xf32>
    %83 = vector.extract_strided_slice %1 {offsets = [0, 0, 13], sizes = [1, 16, 1], strides = [1, 1, 1]} : vector<1x16x16xf32> to vector<1x16x1xf32>
    %84 = vector.extract_strided_slice %5 {offsets = [0, 13, 0], sizes = [1, 1, 128], strides = [1, 1, 1]} : vector<1x16x128xf32> to vector<1x1x128xf32>
    %85 = vector.broadcast %83 : vector<1x16x1xf32> to vector<1x16x128xf32>
    %86 = vector.broadcast %84 : vector<1x1x128xf32> to vector<1x16x128xf32>
    %87 = arith.mulf %85, %86 : vector<1x16x128xf32>
    %88 = arith.addf %82, %87 : vector<1x16x128xf32>
    %89 = vector.extract_strided_slice %1 {offsets = [0, 0, 14], sizes = [1, 16, 1], strides = [1, 1, 1]} : vector<1x16x16xf32> to vector<1x16x1xf32>
    %90 = vector.extract_strided_slice %5 {offsets = [0, 14, 0], sizes = [1, 1, 128], strides = [1, 1, 1]} : vector<1x16x128xf32> to vector<1x1x128xf32>
    %91 = vector.broadcast %89 : vector<1x16x1xf32> to vector<1x16x128xf32>
    %92 = vector.broadcast %90 : vector<1x1x128xf32> to vector<1x16x128xf32>
    %93 = arith.mulf %91, %92 : vector<1x16x128xf32>
    %94 = arith.addf %88, %93 : vector<1x16x128xf32>
    %95 = vector.extract_strided_slice %1 {offsets = [0, 0, 15], sizes = [1, 16, 1], strides = [1, 1, 1]} : vector<1x16x16xf32> to vector<1x16x1xf32>
    %96 = vector.extract_strided_slice %5 {offsets = [0, 15, 0], sizes = [1, 1, 128], strides = [1, 1, 1]} : vector<1x16x128xf32> to vector<1x1x128xf32>
    %97 = vector.broadcast %95 : vector<1x16x1xf32> to vector<1x16x128xf32>
    %98 = vector.broadcast %96 : vector<1x1x128xf32> to vector<1x16x128xf32>
    %99 = arith.mulf %97, %98 : vector<1x16x128xf32>
    %100 = arith.addf %94, %99 : vector<1x16x128xf32>
    %c0_7 = arith.constant 0 : index
    %c0_8 = arith.constant 0 : index
    %101 = vector.load %arg4[%c0_7, %c0_8] : memref<1x128xf32, #tpu.memory_space<vmem>>, vector<1x128xf32>
    %102 = vector.shape_cast %101 : vector<1x128xf32> to vector<1x1x128xf32>
    %103 = vector.broadcast %102 : vector<1x1x128xf32> to vector<1x16x128xf32>
    %104 = arith.addf %100, %103 : vector<1x16x128xf32>
    %c0_9 = arith.constant 0 : index
    %105 = memref.load %arg5[%c0_9] : memref<1xf32, #tpu.memory_space<smem>>
    %cst_10 = arith.constant 0.000000e+00 : f32
    %106 = vector.broadcast %cst_10 : f32 to vector<1x16x128xf32>
    %107 = arith.cmpf ogt, %104, %106 : vector<1x16x128xf32>
    %108 = vector.broadcast %105 : f32 to vector<1x16x128xf32>
    %109 = arith.mulf %108, %104 : vector<1x16x128xf32>
    %110 = arith.select %107, %104, %109 : vector<1x16x128xi1>, vector<1x16x128xf32>
    %c0_11 = arith.constant 0 : index
    %c0_12 = arith.constant 0 : index
    %c0_13 = arith.constant 0 : index
    %111 = vector.load %arg6[%c0_11, %c0_12, %c0_13] : memref<1x16x128xf32, #tpu.memory_space<vmem>>, vector<1x16x128xf32>
    tpu.vector_store %arg6[%c0_11, %c0_12, %c0_13], %110 {strides = array<i32>} : memref<1x16x128xf32, #tpu.memory_space<vmem>>, vector<1x16x128xf32>,
    return
  }
  func.func @transform_0(%arg0: i32) -> (i32, i32, i32) {
    %c0_i32 = arith.constant 0 : i32
    %c0_i32_0 = arith.constant 0 : i32
    %c0_i32_1 = arith.constant 0 : i32
    return %arg0, %c0_i32, %c0_i32_0 : i32, i32, i32
  }
  func.func @transform_1(%arg0: i32) -> (i32, i32, i32) {
    %c0_i32 = arith.constant 0 : i32
    %c0_i32_0 = arith.constant 0 : i32
    %c0_i32_1 = arith.constant 0 : i32
    return %arg0, %c0_i32, %c0_i32_0 : i32, i32, i32
  }
  func.func @transform_2(%arg0: i32) -> (i32, i32) {
    %c0_i32 = arith.constant 0 : i32
    %c0_i32_0 = arith.constant 0 : i32
    %c0_i32_1 = arith.constant 0 : i32
    return %c0_i32, %c0_i32_0 : i32, i32
  }
  func.func @transform_3(%arg0: i32) -> (i32, i32) {
    %c0_i32 = arith.constant 0 : i32
    %c0_i32_0 = arith.constant 0 : i32
    %c0_i32_1 = arith.constant 0 : i32
    return %c0_i32, %c0_i32_0 : i32, i32
  }
  func.func @transform_4(%arg0: i32) -> i32 {
    %c0_i32 = arith.constant 0 : i32
    %c0_i32_0 = arith.constant 0 : i32
    return %c0_i32 : i32
  }
  func.func @transform_5(%arg0: i32) -> (i32, i32, i32) {
    %c0_i32 = arith.constant 0 : i32
    %c0_i32_0 = arith.constant 0 : i32
    %c0_i32_1 = arith.constant 0 : i32
    return %arg0, %c0_i32, %c0_i32_0 : i32, i32, i32
  }
}

</mosaic_0001>

<bundles_post_ra>
// kernel: tpu_custom_call.1
= control target key start
LH: loop header
LB: loop body
LE: loop exit
PB: predicated region body
PF: predicated region fallthrough
CT: control target
= control target key end

     0   :  { %s1567_s0 = inlined_call_operand.hbm [shape: f32[2,16,128], index: 0, kind: input, shape index: {}]   ;;  %s1568_s1 = inlined_call_operand.hbm [shape: f32[2,16,16], index: 1, kind: input, shape index: {}]   ;;  %s1569_s2 = inlined_call_operand.hbm [shape: f32[128,128], index: 2, kind: input, shape index: {}]   ;;  %s1570_s3 = inlined_call_operand.vmem [shape: f32[1,128], index: 3, kind: input, shape index: {}]   ;;  %s1571_s4 = inlined_call_operand.<no memory space> [shape: f32[1], index: 4, kind: input, shape index: {}]   ;;  %s1572_s5 = inlined_call_operand.hbm [shape: f32[2,16,128], index: 5, kind: output, shape index: {}]  }
   0x1   :  { %1580 = sst [smem:[#allocation15_spill]] %s1567_s0 }
   0x2   :  { %1581 = sst [smem:[#allocation16_spill]] %s1569_s2 }
   0x3   :  { %10 = sst [smem:[#allocation2]] %s1571_s4 }
   0x4   :  { %11 = vsyncpa [#allocation4], 0 }
   0x5   :  { %13 = vsyncpa [#allocation4 + $0x1], 0 }
   0x6   :  { %14 = vsyncpa [#allocation7], 0 }
   0x7   :  { %16 = vsyncpa [#allocation7 + $0x1], 0 }
   0x8   :  { %17 = vsyncpa [#allocation5], 0 }
   0x9   :  { %19 = vsyncpa [#allocation5 + $0x1], 0  ;;  %s1225_s20 = smov 0   ;;  %s1227_s21 = smov 0  }
   0xa   :  { %s1229_s22 = smov 0   ;;  %s1231_s23 = smov 0  }
   0xb LB: > { %s1246_s4 = sadd.s32 4294967295, %s1166_s23   ;;  %s787_s24 = sadd.s32 4294967294, %s1166_s23   ;;  %s1166_s23 = sphi %s1231_s23, %s1604_s23   ;;  %s1162_s22 = sphi %s1229_s22, %s1603_s22   ;;  %s1158_s21 = sphi %s1227_s21, %s1602_s21   ;;  %s1154_s20 = sphi %s1225_s20, %s1601_s20  }
   0xc   : > { %p45_p0 = scmp.ne.s32.totalorder %s1158_s21, %s1154_s20  ;;  %p1573_p1 = scmp.eq.s32.totalorder %s1246_s4, 0 }
   0xd   : > { %p164_p3 = scmp.eq.s32.totalorder %s787_s24, 1  ;;  %p788_p5 = scmp.ge.s32.totalorder %s1166_s23, 1 }
   0xe   : > { %p1255_p4 = por %p1573_p1, %p45_p0  ;;  %p171_p7 = scmp.lt.s32.totalorder %s1166_s23, 3 }
   0xf   : > { %p1260_p6 = por %p164_p3, %p45_p0  ;;  %s1168_s28 = smov [#allocation8]  }
  0x10   : > { %s1582_s25 = scalar_select %p1255_p4, 1, 0 }
  0x11   : > { %s1583_s26 = scalar_select %p1260_p6, 1, 0 }
  0x12   : > { %p1265_p8 = pnand %p788_p5, %p171_p7  ;;  %s183_s29 = sshll.u32 %s1168_s28, 4  ;;  %s1269_s29 = int_to_ptr.vmem [resolvable:$true] %s183_s29 }
  0x13   : > { %s1281_s6 = sadd.s32 1, %s1166_s23   ;;  %s32_s7 = sadd.s32 1, %s1162_s22 }
  0x14   : > { %s1584_s27 = scalar_select %p1265_p8, 1, 0 }
  0x15   : > { %p906_p9 = pneg %p1265_p8  ;;  %s29_s8 = ssub.s32 %s1166_s23, %s1281_s6 }
  0x16   : > { %s1586_s2 = sld [smem:[#allocation16_spill]] }
  0x17   : > { %p1276_p11 = pnand %p906_p9, %p1573_p1 }
  0x19   : > { %p1006_p13 = pneg %p1276_p11 }
  0x1c   : > { %s1004_s11 = scalar_lea.hbm %s1586_s2, 2048 }
  0x1d   : > { %p1005_p12 = scmp.ne.s32.totalorder %s1586_s2, %s1004_s11  ;;  %p1011_p5 = scmp.lt.u32.totalorder %s1004_s11, %s1586_s2 }
  0x1f   : > { %p1007_p0 = pnand %p1006_p13, %p1005_p12 }
  0x21   : > { %p1008_p3 = pneg %p1007_p0 }
  0x23   : > { %p1013_p7 = pnand %p1011_p5, %p1008_p3 }
  0x25   : > { %1016 = shalt.err (!%p1013_p7)
}
  0x26   : > { %s1017_s16 = scalar_lea.vmem %s1269_s29, 2048  ;;  %p1025_p2 = scmp.lt.s32.totalorder %s1269_s29, %s1269_s29 }
  0x27   : > { %p1018_p9 = scmp.ne.s32.totalorder %s1269_s29, %s1017_s16  ;;  %p1026_p6 = scmp.lt.s32.totalorder %s1017_s16, %s1017_s16 }
  0x29   : > { %p1020_p10 = pnand %p1018_p9, %p1006_p13  ;;  %p1027_p4 = por %p1026_p6, %p1025_p2 }
  0x2b   : > { %p1021_p1 = pneg %p1020_p10 }
  0x2d   : > { %p1028_p8 = pnand %p1027_p4, %p1021_p1 }
  0x2f   : > { %1031 = shalt.err (!%p1028_p8)
}
  0x30   : > { %s1576_s17 = smov 128   ;;  %s1578_s18 = smov 8  }
  0x31   : > { %909 = dma.hbm_to_vmem [thread:$0]  (!%p1276_p11), %s1586_s2, 2048, %s1269_s29, [#allocation7], %s1576_s17, %s1576_s17, %s1578_s18  }
  0x32   : > { %p30_p1 = scmp.eq.s32.totalorder %s29_s8, 0  ;;  %p39_p2 = scmp.ne.s32.totalorder %s1162_s22, %s1158_s21 }
  0x33   : > { %p40_p4 = scmp.eq.s32.totalorder %s1166_s23, 0  ;;  %p922_p6 = scmp.lt.s32.totalorder %s1166_s23, 2 }
  0x34   : > { %s1315_s28 = scalar_select %p30_p1, %s1162_s22, %s32_s7  }
  0x35   : > { %p41_p8 = por %p40_p4, %p39_p2  ;;  %p1588_p10 = scmp.eq.s32.totalorder %s1246_s4, 1 }
  0x36   : > { %1587 = sst [smem:[#allocation14_spill]] %s1315_s28  ;;  %s203_s30 = sand.u32 1, %s1162_s22  }
  0x37   : > { %p1319_p12 = por %p1588_p10, %p39_p2  ;;  %s808_s10 = sshll.u32 %s1166_s23, 8 }
  0x38   : > { %s1325_s11 = sshll.u32 %s203_s30, 4  ;;  %s1590_s0 = sld [smem:[#allocation15_spill]] }
  0x39   : > { %s207_s7 = scalar_lea.vmem [#allocation3], %s1325_s11  ;;  %p1333_p11 = pnand %p922_p6, %p41_p8 }
  0x3a   : > { %s214_s8 = sshll.u32 %s207_s7, 4  ;;  %s1342_s19 = scalar_lea.hbm %s1568_s1, %s808_s10  ;;  %s1337_s8 = int_to_ptr.vmem [resolvable:$true] %s214_s8 }
  0x3b   : > { %s1344_s24 = scalar_lea.sflag [#allocation4], %s203_s30  ;;  %p1034_p0 = pneg %p1333_p11 }
  0x3e   : > { %s1330_s29 = scalar_lea.hbm %s1590_s0, %s808_s10  ;;  %s1037_s17 = scalar_lea.hbm %s1590_s0, 512 }
  0x3f   : > { %s1032_s12 = scalar_lea.hbm %s1330_s29, 256  ;;  %p1038_p7 = scmp.lt.u32.totalorder %s1330_s29, %s1590_s0 }
  0x40   : > { %p1033_p13 = scmp.ne.s32.totalorder %s1330_s29, %s1032_s12  ;;  %p1039_p9 = scmp.lt.u32.totalorder %s1037_s17, %s1032_s12 }
  0x41   : > { %p1041_p2 = scmp.lt.u32.totalorder %s1032_s12, %s1330_s29 }
  0x42   : > { %p1035_p3 = pnand %p1034_p0, %p1033_p13  ;;  %p1040_p1 = por %p1039_p9, %p1038_p7 }
  0x44   : > { %p1036_p5 = pneg %p1035_p3  ;;  %p1042_p4 = por %p1041_p2, %p1040_p1 }
  0x46   : > { %p1043_p6 = pnand %p1042_p4, %p1036_p5 }
  0x48   : > { %1046 = shalt.err (!%p1043_p6)
}
  0x49   : > { %s1047_s30 = scalar_lea.vmem %s1337_s8, 256  ;;  %s1171_s10 = smov [#allocation3]  }
  0x4a   : > { %p1048_p8 = scmp.ne.s32.totalorder %s1337_s8, %s1047_s30  ;;  %s1052_s15 = sshll.u32 %s1171_s10, 4  ;;  %s1053_s15 = int_to_ptr.vmem [resolvable:$false] %s1052_s15 }
  0x4b   : > { %s1054_s2 = scalar_lea.vmem %s1053_s15, 512  ;;  %p1055_p3 = scmp.lt.s32.totalorder %s1337_s8, %s1053_s15 }
  0x4c   : > { %p1050_p10 = pnand %p1048_p8, %p1034_p0  ;;  %p1056_p7 = scmp.lt.s32.totalorder %s1054_s2, %s1047_s30 }
  0x4e   : > { %p1051_p13 = pneg %p1050_p10  ;;  %p1057_p9 = por %p1056_p7, %p1055_p3 }
  0x50   : > { %p1058_p1 = pnand %p1057_p9, %p1051_p13 }
  0x52   : > { %1061 = shalt.err (!%p1058_p1)
}
  0x53   : > { %s1592_s17 = smov 8   ;;  %s1593_s18 = smov 128  }
  0x54   : > { %913 = dma.hbm_to_vmem [thread:$0]  (!%p1333_p11), %s1330_s29, 256, %s1337_s8, %s1344_s24, %s1593_s18, %s1593_s18, %s1592_s17  }
  0x55   : > { %s228_s16 = scalar_lea.vmem [#allocation6], %s1325_s11  ;;  %s224_s13 = sand.u32 1, %s1166_s23  }
  0x56   : > { %s235_s12 = sshll.u32 %s228_s16, 4  ;;  %s1379_s7 = scalar_lea.sflag [#allocation7], %s224_s13  ;;  %s1377_s12 = int_to_ptr.vmem [resolvable:$true] %s235_s12 }
  0x57   : > { %s1062_s30 = scalar_lea.hbm %s1342_s19, 256  ;;  %s1067_s2 = scalar_lea.hbm %s1568_s1, 512 }
  0x58   : > { %p1063_p5 = scmp.ne.s32.totalorder %s1342_s19, %s1062_s30  ;;  %p1068_p6 = scmp.lt.u32.totalorder %s1342_s19, %s1568_s1 }
  0x59   : > { %p1069_p8 = scmp.lt.u32.totalorder %s1067_s2, %s1062_s30  ;;  %p1071_p13 = scmp.lt.u32.totalorder %s1062_s30, %s1342_s19 }
  0x5a   : > { %p1065_p2 = pnand %p1063_p5, %p1034_p0 }
  0x5b   : > { %p1070_p10 = por %p1069_p8, %p1068_p6 }
  0x5c   : > { %p1066_p4 = pneg %p1065_p2 }
  0x5d   : > { %p1072_p3 = por %p1071_p13, %p1070_p10 }
  0x5f   : > { %p1073_p7 = pnand %p1072_p3, %p1066_p4 }
  0x61   : > { %1076 = shalt.err (!%p1073_p7)
}
  0x62   : > { %s1077_s11 = scalar_lea.vmem %s1377_s12, 256  ;;  %s1172_s29 = smov [#allocation6]  }
  0x63   : > { %p1078_p9 = scmp.ne.s32.totalorder %s1377_s12, %s1077_s11  ;;  %s1082_s8 = sshll.u32 %s1172_s29, 4  ;;  %s1083_s8 = int_to_ptr.vmem [resolvable:$false] %s1082_s8 }
  0x64   : > { %s1084_s0 = scalar_lea.vmem %s1083_s8, 512  ;;  %p1085_p2 = scmp.lt.s32.totalorder %s1377_s12, %s1083_s8 }
  0x65   : > { %p1080_p1 = pnand %p1078_p9, %p1034_p0  ;;  %p1086_p6 = scmp.lt.s32.totalorder %s1084_s0, %s1077_s11 }
  0x67   : > { %p1081_p5 = pneg %p1080_p1  ;;  %p1087_p8 = por %p1086_p6, %p1085_p2 }
  0x69   : > { %p1088_p10 = pnand %p1087_p8, %p1081_p5 }
  0x6b   : > { %1091 = shalt.err (!%p1088_p10)
}
  0x6c   : > { %916 = dma.hbm_to_vmem [thread:$0]  (!%p1333_p11), %s1342_s19, 256, %s1377_s12, %s1379_s7, %s1593_s18, %s1593_s18, %s1592_s17  }
  0x6d   : > { %p1594_p0 = scmp.ne.s32.totalorder %s1584_s27, 0 }
  0x6e   : > { %s1411_s28 = sand.u32 (!%p1594_p0), 1, %s1158_s21   ;;  %p1595_p4 = scmp.ne.s32.totalorder (!%p1594_p0), %s1582_s25, 0 }
  0x6f   : > { %247 = sbr.rel (%p1594_p0) target bundleno = 427 (0x1ab), region = 40  ;;  %s1414_s24 = sshll.u32 (!%p1594_p0), %s1411_s28, 4 }
  0x70   : > { %s250_s14 = scalar_lea.sflag (!%p1594_p0), [#allocation4], %s1411_s28  ;;  %s253_s16 = scalar_lea.vmem (!%p1594_p0), [#allocation3], %s1414_s24 }
  0x76   : > { %1137 = dma.done.wait (%p1595_p4), %s250_s14, 256  }
  0x77   : > { %1139 = vsyncadd (%p1595_p4), %s250_s14, 4294967040  ;;  %s258_s27 = sand.u32 1, %s1246_s4   ;;  %s262_s17 = scalar_lea.vmem [#allocation6], %s1414_s24 }
  0x78   : > { %s259_s19 = scalar_lea.sflag [#allocation7], %s258_s27 }
  0x79   : > { %1141 = dma.done.wait (%p1595_p4), %s259_s19, 256  }
  0x7a   : > { %1143 = vsyncadd (%p1595_p4), %s259_s19, 4294967040  ;;  %p1596_p11 = scmp.eq.s32.totalorder %s1246_s4, 0 }
  0x7c   : > { %1145 = dma.done.wait (%p1596_p11), [#allocation7], 2048   ;;  %p1597_p13 = pmov %p1596_p11 }
  0x7d   : > { %v1173_v0 = vmov 1   ;;  %v1174_v1 = vmov 0   ;;  %v302_v2 = vld [vmem:[#allocation8] sm:$0xff]  ;;  %v303_v3 = vld [vmem:[#allocation8 + $0x8] sm:$0xff]  ;;  %v304_v4 = vld [vmem:[#allocation8 + $0x10] sm:$0xff]  ;;  %v1175_v22 = vmov 2   ;;  %v403_v62 = vlaneseq }
  0x7e   : > { %1147 = vsyncadd (%p1597_p13), [#allocation7], 4294965248  ;;  %979 = vset.pattern.permute.xlu1 %v1173_v0  ;;  %978 = vset.pattern.permute.xlu0 %v1174_v1  ;;  %v864_v5 = vpack.c.bf16 %v303_v3, %v302_v2  ;;  %v305_v6 = vld [vmem:[#allocation8 + $0x18] sm:$0xff]  ;;  %v306_v8 = vld [vmem:[#allocation8 + $0x20] sm:$0xff]  ;;  %v1176_v26 = vmov 3   ;;  %v1177_v30 = vmov 4  }
  0x7f   : > { %v868_v7 = vpack.c.bf16 %v305_v6, %v304_v4  ;;  %v307_v9 = vld [vmem:[#allocation8 + $0x28] sm:$0xff]  ;;  %v1432_v11 = vld [vmem:[%s262_s17] sm:$0xff]  ;;  %v309_v14 = vld [vmem:[#allocation8 + $0x38] sm:$0xff]  ;;  %v1178_v32 = vmov 5   ;;  %v1179_v33 = vmov 6   ;;  %v1180_v35 = vmov 8  }
  0x80   : > { %865 = vmatprep.subr.bf16.mxu0 %v864_v5  ;;  %v872_v10 = vpack.c.bf16 %v307_v9, %v306_v8  ;;  %v298_v12 = vld [vmem:[%s253_s16] sm:$0xff]  ;;  %410 = vperm.xlu1 %979, %v1432_v11   ;;  %v1437_v15 = vld [vmem:[%s262_s17 + $0x8] sm:$0xff]  ;;  %v1181_v36 = vmov 9   ;;  %v1182_v37 = vmov 7   ;;  %v1183_v38 = vmov 11   ;;  %s658_s25 = sld [smem:[#allocation2]] }
  0x81   : > { %867 = vmatpush3.bf16.msra.mxu0 %v864_v5  ;;  %v308_v13 = vld [vmem:[#allocation8 + $0x30] sm:$0xff]  ;;  %861 = vmatprep.mubr.f32.mxu0 %v298_v12  ;;  %v310_v17 = vld [vmem:[#allocation8 + $0x40] sm:$0xff]  ;;  %v311_v18 = vld [vmem:[#allocation8 + $0x48] sm:$0xff]  ;;  %v1184_v39 = vmov 12   ;;  %v1185_v40 = vmov 14   ;;  %v1186_v41 = vmov 15  }
  0x82   : > { %869 = vmatprep.subr.bf16.mxu0 %v868_v7  ;;  %395 = vperm.xlu0 %978, %v1432_v11   ;;  %v876_v16 = vpack.c.bf16 %v309_v14, %v308_v13  ;;  %v880_v19 = vpack.c.bf16 %v311_v18, %v310_v17  ;;  %v312_v20 = vld [vmem:[#allocation8 + $0x50] sm:$0xff]  ;;  %v313_v21 = vld [vmem:[#allocation8 + $0x58] sm:$0xff]  ;;  %v314_v24 = vld [vmem:[#allocation8 + $0x60] sm:$0xff]  ;;  %v1187_v42 = vmov 10   ;;  %v1188_v43 = vmov 13   ;;  %s810_s13 = sshll.u32 %s1246_s4, 8 }
  0x83   : > { %v884_v23 = vpack.c.bf16 %v313_v21, %v312_v20  ;;  %v315_v25 = vld [vmem:[#allocation8 + $0x68] sm:$0xff]  ;;  %v316_v28 = vld [vmem:[#allocation8 + $0x70] sm:$0xff]  ;;  %v317_v29 = vld [vmem:[#allocation8 + $0x78] sm:$0xff]  ;;  %v1484_v1 = vshrl.u32 %v403_v62, 7  ;;  %s297_s7 = scalar_lea.vmem [#allocation9], %s1414_s24  ;;  %s1521_s2 = scalar_lea.hbm %s1572_s5, %s810_s13 }
  0x84   : > { %414 = vperm.xlu1 %979, %v1437_v15   ;;  %v888_v27 = vpack.c.bf16 %v315_v25, %v314_v24  ;;  %v892_v31 = vpack.c.bf16 %v317_v29, %v316_v28  ;;  %v299_v34 = vld [vmem:[%s253_s16 + $0x8] sm:$0xff]  ;;  %s682_s30 = sshll.u32 %s297_s7, 4  ;;  %s669_s4 = scalar_lea.sflag [#allocation5], %s1411_s28  ;;  %s1523_s30 = int_to_ptr.vmem [resolvable:$true] %s682_s30 }
  0x85   : > { %871 = vmatpush3.bf16.msra.mxu0 %v868_v7  ;;  %v405_v2 = vsub.s32 0, %v1484_v1  ;;  %v419_v3 = vsub.s32 1, %v1484_v1  ;;  %v435_v4 = vsub.s32 2, %v1484_v1  ;;  %v451_v7 = vsub.s32 3, %v1484_v1  ;;  %s1092_s11 = scalar_lea.vmem %s1523_s30, 256  ;;  %s1189_s29 = smov [#allocation9]  }
  0x86   : > { %873 = vmatprep.subr.bf16.mxu0 %v872_v10  ;;  %400 = vperm.xlu0 %978, %v1437_v15   ;;  %v515_v28 = vsub.s32 7, %v1484_v1  ;;  %p1093_p3 = scmp.ne.s32.totalorder %s1523_s30, %s1092_s11  ;;  %s1096_s8 = sshll.u32 %s1189_s29, 4  ;;  %s1097_s8 = int_to_ptr.vmem [resolvable:$false] %s1096_s8 }
  0x87   : > { %s1098_s0 = scalar_lea.vmem %s1097_s8, 512  ;;  %p1099_p1 = scmp.lt.s32.totalorder %s1523_s30, %s1097_s8 }
  0x88   : > { %981 = vset.pattern.permute.xlu1 %v1175_v22  ;;  %p1094_p7 = pnand %p1093_p3, %p1319_p12  ;;  %p1100_p5 = scmp.lt.s32.totalorder %s1098_s0, %s1092_s11 }
  0x89   : > { %875 = vmatpush3.bf16.msra.mxu0 %v872_v10  ;;  %430 = vperm.xlu1 %981, %v1437_v15   ;;  %v467_v10 = vsub.s32 4, %v1484_v1 }
  0x8a   : > { %877 = vmatprep.subr.bf16.mxu0 %v876_v16  ;;  %980 = vset.pattern.permute.xlu0 %v1175_v22  ;;  %v499_v22 = vsub.s32 6, %v1484_v1  ;;  %p1095_p9 = pneg %p1094_p7  ;;  %p1101_p2 = por %p1100_p5, %p1099_p1 }
  0x8b   : > { %426 = vperm.xlu0 %980, %v1432_v11  }
  0x8c   : > { %p1102_p6 = pnand %p1101_p2, %p1095_p9 }
  0x8d   : > { %879 = vmatpush3.bf16.msra.mxu0 %v876_v16  ;;  %982 = vset.pattern.permute.xlu1 %v1176_v26 }
  0x8e   : > { %881 = vmatprep.subr.bf16.mxu0 %v880_v19  ;;  %442 = vperm.xlu1 %982, %v1432_v11  }
  0x8f   : > { %983 = vset.pattern.permute.xlu0 %v1176_v26 }
  0x90   : > { %446 = vperm.xlu0 %983, %v1437_v15  }
  0x91   : > { %883 = vmatpush3.bf16.msra.mxu0 %v880_v19 }
  0x92   : > { %885 = vmatprep.subr.bf16.mxu0 %v884_v23  ;;  %984 = vset.pattern.permute.xlu1 %v1177_v30 }
  0x93   : > { %458 = vperm.xlu1 %984, %v1432_v11  }
  0x94   : > { %985 = vset.pattern.permute.xlu0 %v1178_v32 }
  0x95   : > { %887 = vmatpush3.bf16.msra.mxu0 %v884_v23  ;;  %474 = vperm.xlu0 %985, %v1432_v11  }
  0x96   : > { %889 = vmatprep.subr.bf16.mxu0 %v888_v27 }
  0x97   : > { %462 = vperm.xlu1 %984, %v1437_v15  }
  0x99   : > { %891 = vmatpush3.bf16.msra.mxu0 %v888_v27  ;;  %988 = vset.pattern.permute.xlu0 %v1179_v33 }
  0x9a   : > { %893 = vmatprep.subr.bf16.mxu0 %v892_v31  ;;  %494 = vperm.xlu0 %988, %v1437_v15  }
  0x9b   : > { %986 = vset.pattern.permute.xlu1 %v1178_v32 }
  0x9c   : > { %478 = vperm.xlu1 %986, %v1437_v15  }
  0x9d   : > { %895 = vmatpush3.bf16.msra.mxu0 %v892_v31 }
  0x9e   : > { %990 = vset.pattern.permute.xlu0 %v1180_v35 }
  0x9f   : > { %522 = vperm.xlu0 %990, %v1432_v11  }
  0xa0   : > { %862 = vmatmul.mubr.f32.vlgmr.msra.gmra.mrb[0].mxu0 %v299_v34  ;;  %987 = vset.pattern.permute.xlu1 %v1179_v33 }
  0xa1   : > { %490 = vperm.xlu1 %987, %v1432_v11  }
  0xa3   : > { %993 = vset.pattern.permute.xlu0 %v1181_v36 }
  0xa4   : > { %542 = vperm.xlu0 %993, %v1437_v15  }
  0xa5   : > { %989 = vset.pattern.permute.xlu1 %v1182_v37 }
  0xa6   : > { %506 = vperm.xlu1 %989, %v1432_v11  }
  0xa8   : > { %995 = vset.pattern.permute.xlu0 %v1183_v38 }
  0xa9   : > { %570 = vperm.xlu0 %995, %v1432_v11  }
  0xaa   : > { %510 = vperm.xlu1 %989, %v1437_v15  }
  0xad   : > { %998 = vset.pattern.permute.xlu0 %v1184_v39 }
  0xae   : > { %991 = vset.pattern.permute.xlu1 %v1180_v35  ;;  %590 = vperm.xlu0 %998, %v1437_v15  }
  0xaf   : > { %526 = vperm.xlu1 %991, %v1437_v15  }
  0xb2   : > { %1000 = vset.pattern.permute.xlu0 %v1185_v40 }
  0xb3   : > { %992 = vset.pattern.permute.xlu1 %v1181_v36  ;;  %618 = vperm.xlu0 %1000, %v1432_v11  }
  0xb4   : > { %538 = vperm.xlu1 %992, %v1432_v11  }
  0xb7   : > { %1003 = vset.pattern.permute.xlu0 %v1186_v41 }
  0xb8   : > { %994 = vset.pattern.permute.xlu1 %v1187_v42  ;;  %638 = vperm.xlu0 %1003, %v1437_v15  }
  0xb9   : > { %554 = vperm.xlu1 %994, %v1432_v11  }
  0xbd   : > { %558 = vperm.xlu1 %994, %v1437_v15  }
  0xc1   : > { %996 = vset.pattern.permute.xlu1 %v1183_v38 }
  0xc2   : > { %574 = vperm.xlu1 %996, %v1437_v15  }
  0xc6   : > { %997 = vset.pattern.permute.xlu1 %v1184_v39 }
  0xc7   : > { %586 = vperm.xlu1 %997, %v1432_v11  }
  0xcb   : > { %999 = vset.pattern.permute.xlu1 %v1188_v43 }
  0xcc   : > { %602 = vperm.xlu1 %999, %v1432_v11  }
  0xd0   : > { %606 = vperm.xlu1 %999, %v1437_v15  }
  0xd4   : > { %1001 = vset.pattern.permute.xlu1 %v1185_v40 }
  0xd5   : > { %622 = vperm.xlu1 %1001, %v1437_v15   ;;  %v483_v15 = vsub.s32 5, %v1484_v1 }
  0xd9   : > { %1002 = vset.pattern.permute.xlu1 %v1186_v41 }
  0xda   : > { %634 = vperm.xlu1 %1002, %v1432_v11  }
  0xff   : > { %v411_v44 = vpop.permute.xlu1 %410 }
 0x101   : > { %v396_v53 = vpop.permute.xlu0 %395 }
 0x103   : > { %v415_v45 = vpop.permute.xlu1 %414 }
 0x105   : > { %v401_v55 = vpop.permute.xlu0 %400 }
 0x108   : > { %v431_v46 = vpop.permute.xlu1 %430 }
 0x10a   : > { %v427_v57 = vpop.permute.xlu0 %426 }
 0x10d   : > { %v443_v47 = vpop.permute.xlu1 %442 }
 0x10f   : > { %v447_v59 = vpop.permute.xlu0 %446 }
 0x112   : > { %v459_v48 = vpop.permute.xlu1 %458 }
 0x114   : > { %v475_v61 = vpop.permute.xlu0 %474 }
 0x116   : > { %v463_v49 = vpop.permute.xlu1 %462 }
 0x119   : > { %v495_v0 = vpop.permute.xlu0 %494 }
 0x11b   : > { %v479_v50 = vpop.permute.xlu1 %478 }
 0x11e   : > { %v523_v6 = vpop.permute.xlu0 %522 }
 0x120   : > { %v491_v51 = vpop.permute.xlu1 %490 }
 0x123   : > { %v543_v21 = vpop.permute.xlu0 %542 }
 0x125   : > { %v1472_v52 = vpop.permute.xlu1 %506 }
 0x128   : > { %v571_v40 = vpop.permute.xlu0 %570 }
 0x129   : > { %v1474_v54 = vpop.permute.xlu1 %510 }
 0x12e   : > { %v1476_v56 = vpop.permute.xlu1 %526 }
 0x133   : > { %v1478_v58 = vpop.permute.xlu1 %538 }
 0x138   : > { %v1480_v60 = vpop.permute.xlu1 %554 }
 0x13c   : > { %v1482_v63 = vpop.permute.xlu1 %558 }
 0x141   : > { %v1489_v5 = vpop.permute.xlu1 %574 }
 0x146   : > { %v587_v20 = vpop.permute.xlu1 %586 }
 0x14b   : > { %v603_v39 = vpop.permute.xlu1 %602 }
 0x173   : > { %v1492_v8 = vpop.f32.mrb[0].mxu0 }
 0x174   : > { %v384_v9 = vpop.f32.mrb[1].mxu0 }
 0x175   : > { %v406_v11 = vrot.slane %v384_v9, %v405_v2  ;;  %v420_v12 = vrot.slane %v384_v9, %v419_v3  ;;  %v436_v13 = vrot.slane %v384_v9, %v435_v4  ;;  %v452_v14 = vrot.slane %v384_v9, %v451_v7 }
 0x176   : > { %v468_v23 = vrot.slane %v384_v9, %v467_v10  ;;  %v484_v29 = vrot.slane %v384_v9, %v483_v15  ;;  %v500_v34 = vrot.slane %v384_v9, %v499_v22  ;;  %v516_v41 = vrot.slane %v384_v9, %v515_v28  ;;  %v591_v9 = vpop.permute.xlu0 %590 }
 0x177   : > { %v407_v16 = vmul.f32 %v406_v11, %v396_v53  ;;  %v408_v17 = vmul.f32 %v406_v11, %v401_v55  ;;  %v421_v18 = vmul.f32 %v420_v12, %v411_v44  ;;  %v422_v19 = vmul.f32 %v420_v12, %v415_v45  ;;  %v607_v11 = vpop.permute.xlu1 %606 }
 0x178   : > { %v437_v26 = vmul.f32 %v436_v13, %v427_v57  ;;  %v438_v27 = vmul.f32 %v436_v13, %v431_v46  ;;  %v453_v32 = vmul.f32 %v452_v14, %v443_v47  ;;  %v454_v33 = vmul.f32 %v452_v14, %v447_v59 }
 0x179   : > { %v423_v24 = vadd.f32 %v421_v18, %v407_v16  ;;  %v424_v25 = vadd.f32 %v422_v19, %v408_v17  ;;  %v469_v37 = vmul.f32 %v468_v23, %v459_v48  ;;  %v470_v38 = vmul.f32 %v468_v23, %v463_v49 }
 0x17a   : > { %v485_v44 = vmul.f32 %v484_v29, %v475_v61  ;;  %v486_v45 = vmul.f32 %v484_v29, %v479_v50  ;;  %v532_v46 = vrot.slane %v1492_v8, %v405_v2  ;;  %v501_v57 = vmul.f32 %v500_v34, %v491_v51  ;;  %v619_v23 = vpop.permute.xlu0 %618 }
 0x17b   : > { %v439_v30 = vadd.f32 %v437_v26, %v423_v24  ;;  %v440_v31 = vadd.f32 %v438_v27, %v424_v25  ;;  %v502_v62 = vmul.f32 %v500_v34, %v495_v0  ;;  %v548_v47 = vrot.slane %v1492_v8, %v419_v3  ;;  %v623_v19 = vpop.permute.xlu1 %622 }
 0x17c   : > { %v517_v48 = vmul.f32 %v516_v41, %v1472_v52  ;;  %v518_v49 = vmul.f32 %v516_v41, %v1474_v54  ;;  %v564_v12 = vrot.slane %v1492_v8, %v435_v4  ;;  %v533_v13 = vmul.f32 %v532_v46, %v523_v6 }
 0x17d   : > { %v455_v35 = vadd.f32 %v453_v32, %v439_v30  ;;  %v456_v36 = vadd.f32 %v454_v33, %v440_v31  ;;  %v534_v2 = vmul.f32 %v532_v46, %v1476_v56  ;;  %v580_v51 = vrot.slane %v1492_v8, %v451_v7 }
 0x17e   : > { %v549_v3 = vmul.f32 %v548_v47, %v1478_v58  ;;  %v550_v16 = vmul.f32 %v548_v47, %v543_v21  ;;  %v565_v52 = vmul.f32 %v564_v12, %v1480_v60  ;;  %v596_v54 = vrot.slane %v1492_v8, %v467_v10 }
 0x17f   : > { %v471_v42 = vadd.f32 %v469_v37, %v455_v35  ;;  %v472_v43 = vadd.f32 %v470_v38, %v456_v36  ;;  %v566_v4 = vmul.f32 %v564_v12, %v1482_v63  ;;  %v581_v6 = vmul.f32 %v580_v51, %v571_v40  ;;  %v635_v32 = vpop.permute.xlu1 %634 }
 0x180   : > { %v612_v56 = vrot.slane %v1492_v8, %v483_v15  ;;  %v582_v25 = vmul.f32 %v580_v51, %v1489_v5  ;;  %v628_v58 = vrot.slane %v1492_v8, %v499_v22  ;;  %v597_v26 = vmul.f32 %v596_v54, %v587_v20  ;;  %v639_v15 = vpop.permute.xlu0 %638 }
 0x181   : > { %v487_v53 = vadd.f32 %v485_v44, %v471_v42  ;;  %v488_v55 = vadd.f32 %v486_v45, %v472_v43  ;;  %v598_v27 = vmul.f32 %v596_v54, %v591_v9  ;;  %v644_v10 = vrot.slane %v1492_v8, %v515_v28  ;;  %v802_v8 = vld [vmem:[%s1570_s3] ss:$0 sm:$0xff] }
 0x182   : > { %v613_v63 = vmul.f32 %v612_v56, %v603_v39  ;;  %v614_v31 = vmul.f32 %v612_v56, %v607_v11  ;;  %v629_v34 = vmul.f32 %v628_v58, %v619_v23  ;;  %v630_v35 = vmul.f32 %v628_v58, %v623_v19 }
 0x183   : > { %v503_v59 = vadd.f32 %v501_v57, %v487_v53  ;;  %v504_v1 = vadd.f32 %v502_v62, %v488_v55  ;;  %v645_v36 = vmul.f32 %v644_v10, %v635_v32  ;;  %v646_v37 = vmul.f32 %v644_v10, %v639_v15 }
 0x184   : > { %v661_v39 = vstv %s658_s25 }
 0x185   : > { %v519_v61 = vadd.f32 %v517_v48, %v503_v59  ;;  %v520_v50 = vadd.f32 %v518_v49, %v504_v1 }
 0x187   : > { %v535_v0 = vadd.f32 %v533_v13, %v519_v61  ;;  %v536_v14 = vadd.f32 %v534_v2, %v520_v50 }
 0x189   : > { %v551_v17 = vadd.f32 %v549_v3, %v535_v0  ;;  %v552_v18 = vadd.f32 %v550_v16, %v536_v14 }
 0x18b   : > { %v567_v24 = vadd.f32 %v565_v52, %v551_v17  ;;  %v568_v7 = vadd.f32 %v566_v4, %v552_v18 }
 0x18d   : > { %v583_v21 = vadd.f32 %v581_v6, %v567_v24  ;;  %v584_v60 = vadd.f32 %v582_v25, %v568_v7 }
 0x18f   : > { %v599_v29 = vadd.f32 %v597_v26, %v583_v21  ;;  %v600_v30 = vadd.f32 %v598_v27, %v584_v60 }
 0x191   : > { %v615_v33 = vadd.f32 %v613_v63, %v599_v29  ;;  %v616_v5 = vadd.f32 %v614_v31, %v600_v30 }
 0x193   : > { %v631_v22 = vadd.f32 %v629_v34, %v615_v33  ;;  %v632_v20 = vadd.f32 %v630_v35, %v616_v5 }
 0x195   : > { %v647_v28 = vadd.f32 %v645_v36, %v631_v22  ;;  %v648_v38 = vadd.f32 %v646_v37, %v632_v20 }
 0x197   : > { %v656_v40 = vadd.f32 %v802_v8, %v647_v28  ;;  %v657_v41 = vadd.f32 %v802_v8, %v648_v38 }
 0x199   : > { %vm659_vm0 = vcmp.gt.f32.partialorder %v656_v40, 0.0  ;;  %v662_v42 = vmul.f32 %v661_v39, %v656_v40  ;;  %vm660_vm1 = vcmp.gt.f32.partialorder %v657_v41, 0.0  ;;  %v663_v43 = vmul.f32 %v661_v39, %v657_v41 }
 0x19b   : > { %v664_v44 = vsel %vm659_vm0, %v656_v40, %v662_v42  ;;  %v665_v45 = vsel %vm660_vm1, %v657_v41, %v663_v43 }
 0x19c   : > { %666 = vst [vmem:[%s297_s7] sm:$0xff] %v664_v44  ;;  %667 = vst [vmem:[%s297_s7 + $0x8] sm:$0xff] %v665_v45 }
 0x19d   : > { %1105 = shalt.err (!%p1102_p6)
}
 0x19e   : > { %s1106_s24 = scalar_lea.hbm %s1521_s2, 256  ;;  %s1110_s27 = scalar_lea.hbm %s1572_s5, 512 }
 0x19f   : > { %p1107_p8 = scmp.ne.s32.totalorder %s1521_s2, %s1106_s24  ;;  %p1111_p4 = scmp.lt.u32.totalorder %s1521_s2, %s1572_s5 }
 0x1a0   : > { %p1112_p11 = scmp.lt.u32.totalorder %s1110_s27, %s1106_s24  ;;  %p1114_p3 = scmp.lt.u32.totalorder %s1106_s24, %s1521_s2 }
 0x1a1   : > { %p1108_p10 = pnand %p1107_p8, %p1319_p12 }
 0x1a2   : > { %p1113_p13 = por %p1112_p11, %p1111_p4 }
 0x1a3   : > { %p1109_p0 = pneg %p1108_p10 }
 0x1a4   : > { %p1115_p7 = por %p1114_p3, %p1113_p13 }
 0x1a6   : > { %p1116_p9 = pnand %p1115_p7, %p1109_p0 }
 0x1a8   : > { %1119 = shalt.err (!%p1116_p9)
}
 0x1a9   : > { %s1190_s25 = smov 128   ;;  %s1191_s18 = smov 8  }
 0x1aa   : > { %904 = dma.vmem_to_hbm [thread:$0]  (%p1319_p12), %s1523_s30, 256, %s1521_s2, %s669_s4, %s1190_s25, %s1190_s25, %s1191_s18  }
 0x1ab PF: > { %s697_s12 = sand.u32 1, %s1154_s20   ;;  %p1598_p1 = scmp.ne.s32.totalorder %s1583_s26, 0 }
 0x1ac   : > { %p1599_p5 = scmp.ge.s32.totalorder %s1166_s23, 2  ;;  %s698_s13 = scalar_lea.sflag [#allocation5], %s697_s12 }
 0x1ae   : > { %p918_p2 = pnand %p1599_p5, %p1598_p1 }
 0x1b0   : > { %1149 = dma.done.wait (!%p918_p2), %s698_s13, 256  }
 0x1b1   : > { %1151 = vsyncadd (!%p918_p2), %s698_s13, 4294967040  ;;  %s1600_s7 = sld [smem:[#allocation14_spill]]  ;;  %p22_p6 = scmp.ge.s32.totalorder %s1281_s6, 4  }
 0x1b2   : > { %s1601_s20 = smov %s1158_s21  ;;  %s1602_s21 = smov %s1162_s22 }
 0x1b3   : > { %s1604_s23 = smov %s1281_s6  ;;  %24 = sbr.rel (!%p22_p6) target bundleno = 11 (0xb), region = 102 }
 0x1b7   : > { %s1603_s22 = smov %s1600_s7 }
 0x1ba   :  { %703 = vsyncpa [#allocation4], 1 }
 0x1bb   :  { %705 = vsyncpa [#allocation4 + $0x1], 1 }
 0x1bc   :  { %706 = vsyncpa [#allocation7], 1 }
 0x1bd   :  { %708 = vsyncpa [#allocation7 + $0x1], 1 }
 0x1be   :  { %709 = vsyncpa [#allocation5], 1 }
 0x1bf   :  { %711 = vsyncpa [#allocation5 + $0x1], 1 }

</bundles_post_ra>
